<compile_context>
chip_gen: v6e
topology: v6e:2x2x1
jax: 0.10.0
libtpu: 0.0.40
codegen_flags: <defaults>
</compile_context>

<pallas_src>
import math

import jax
import jax.numpy as jnp
from jax.experimental import pallas as pl
from jax.experimental.pallas import tpu as pltpu


def _round_up(x, m):
    return (x + m - 1) // m * m


def _vmem_capacity_bytes():
    """Physical VMEM of this generation (v5e/v6e: 128 MiB, v7x: 64 MiB)."""
    try:
        return int(pltpu.get_tpu_info().vmem_capacity_bytes)
    except Exception:
        return 64 << 20   # conservative (v7x-sized) default


def _sublane(dtype):
    # 8 rows for f32, 16 for bf16, 32 for int8/fp8.
    return max(8, 32 // jnp.dtype(dtype).itemsize)


def _pick_block_tokens(n_tok, model_dim, dtype, requested):
    sub = _sublane(dtype)
    if requested is None:
        # Small model_dim -> bigger blocks for more HBM-efficient writebacks.
        requested = 512 if model_dim <= 256 else 256
    T = max(sub, min(int(requested), _round_up(n_tok, sub)))
    return _round_up(T, sub)


# ---------------------------------------------------------------------------
# Resident path: whole LUT lives in VMEM, exact per-row copy-loop gather.
# ---------------------------------------------------------------------------
def _embed_resident(flat_ids, lut, scale, block_tokens, vmem_cap):
    V, D = lut.shape
    n_tok = flat_ids.shape[0]
    T = _pick_block_tokens(n_tok, D, lut.dtype, block_tokens)
    n_pad = _round_up(n_tok, T)
    n_blocks = n_pad // T

    # Padded ids gather row 0; the padded rows are sliced off by the caller.
    ids_pad = jnp.pad(flat_ids, (0, n_pad - n_tok))

    def kernel(ids_ref, lut_ref, out_ref):
        base = pl.program_id(0) * T

        # Exact gather: one dynamic (1, D) load from the resident LUT and one
        # (1, D) store per token; no MXU work, cost independent of V.
        @pl.loop(0, T)
        def _(r):
            tok = ids_ref[base + r]
            row = lut_ref[pl.ds(tok, 1), :]
            out_ref[pl.ds(r, 1), :] = (row * scale).astype(out_ref.dtype)

    lut_bytes = lut.size * lut.dtype.itemsize
    out_bytes = n_pad * D * jnp.dtype(lut.dtype).itemsize

    # Megacore split only when output traffic clearly dominates the duplicated
    # per-core resident-LUT load (decode-sized batches stay single-core).
    semantics = ("parallel",) if (n_blocks > 1 and out_bytes > 4 * lut_bytes) \
        else ("arbitrary",)

    # Single-buffered LUT + double-buffered (T, D) output + slack.
    est = lut_bytes + 2 * T * D * jnp.dtype(lut.dtype).itemsize + (4 << 20)
    vmem_limit = int(min(max(est, 32 << 20), vmem_cap - (4 << 20)))

    def build(lut_spec):
        return pl.pallas_call(
            kernel,
            out_shape=jax.ShapeDtypeStruct((n_pad, D), lut.dtype),
            grid_spec=pltpu.PrefetchScalarGridSpec(
                num_scalar_prefetch=1,           # ids land in SMEM
                grid=(n_blocks,),
                in_specs=[lut_spec],
                # Dense (T, D) output tile: unmasked, lane-dense writebacks.
                out_specs=pl.BlockSpec((T, D), lambda i, ids: (i, 0)),
            ),
            compiler_params=pltpu.CompilerParams(
                dimension_semantics=semantics,
                vmem_limit_bytes=vmem_limit,
            ),
        )

    # Constant index_map -> the LUT is DMA'd from HBM exactly once.
    # pl.Buffered(1) guarantees the pipeliner allocates a single LUT buffer
    # (no silent 2x VMEM for the resident table).  Fall back to a plain spec
    # if this jax version rejects pipeline_mode here.
    try:
        lut_spec = pl.BlockSpec((V, D), lambda i, ids: (0, 0),
                                pipeline_mode=pl.Buffered(1))
        return build(lut_spec)(ids_pad, lut)
    except Exception:
        lut_spec = pl.BlockSpec((V, D), lambda i, ids: (0, 0))
        return build(lut_spec)(ids_pad, lut)


# ---------------------------------------------------------------------------
# Fallback for tables too large to keep resident: token-blocked manual-DMA
# gather (LUT stays in HBM, per-block row DMAs into a double-buffered VMEM
# staging buffer, dense (T, D) scale + writeback).
# ---------------------------------------------------------------------------
def _embed_hbm_gather(flat_ids, lut, scale, block_tokens, vmem_cap):
    V, D = lut.shape
    n_tok = flat_ids.shape[0]
    # Moderate block: amortizes the ~0.35us/step overhead ~128x while keeping
    # the number of in-flight row DMAs per block reasonable.
    T = _pick_block_tokens(n_tok, D, lut.dtype,
                           128 if block_tokens is None else block_tokens)
    n_pad = _round_up(n_tok, T)
    n_blocks = n_pad // T
    ids_pad = jnp.pad(flat_ids, (0, n_pad - n_tok))

    def kernel(ids_ref, lut_hbm, out_ref, buf, sem):
        i = pl.program_id(0)
        nb = pl.num_programs(0)

        def issue(block_idx, slot):
            base = block_idx * T

            @pl.loop(0, T)
            def _(r):
                tok = ids_ref[base + r]
                pltpu.make_async_copy(
                    lut_hbm.at[pl.ds(tok, 1), :],
                    buf.at[slot, pl.ds(r, 1), :],
                    sem.at[slot],
                ).start()

        # Prime slot 0 on the first block, then prefetch the next block's rows
        # while the current block is being consumed (double buffering).
        @pl.when(i == 0)
        def _():
            issue(0, 0)

        @pl.when(i + 1 < nb)
        def _():
            issue(i + 1, (i + 1) & 1)

        slot = i & 1

        # Wait for this block's T row copies (descriptors match the starts).
        @pl.loop(0, T)
        def _(r):
            pltpu.make_async_copy(
                lut_hbm.at[pl.ds(0, 1), :],
                buf.at[slot, pl.ds(r, 1), :],
                sem.at[slot],
            ).wait()

        # One dense (T, D) scale + store -> full-width writeback DMA.
        out_ref[...] = (buf[slot] * scale).astype(out_ref.dtype)

    item = jnp.dtype(lut.dtype).itemsize
    est = 2 * T * D * item + 2 * T * D * item + (4 << 20)
    vmem_limit = int(min(max(est, 32 << 20), vmem_cap - (4 << 20)))

    return pl.pallas_call(
        kernel,
        out_shape=jax.ShapeDtypeStruct((n_pad, D), lut.dtype),
        grid_spec=pltpu.PrefetchScalarGridSpec(
            num_scalar_prefetch=1,
            grid=(n_blocks,),
            in_specs=[pl.BlockSpec(memory_space=pl.ANY)],   # LUT stays in HBM
            out_specs=pl.BlockSpec((T, D), lambda i, ids: (i, 0)),
            scratch_shapes=[
                pltpu.VMEM((2, T, D), lut.dtype),
                pltpu.SemaphoreType.DMA((2,)),
            ],
        ),
        compiler_params=pltpu.CompilerParams(
            dimension_semantics=("arbitrary",),   # cross-step buffer state
            vmem_limit_bytes=vmem_limit,
        ),
    )(ids_pad, lut)


# ---------------------------------------------------------------------------
# Public wrapper: Pallas equivalent of Embeddings.forward.
# ---------------------------------------------------------------------------
def embeddings_forward(ids, lut, *, block_tokens=None, force_hbm_gather=False):
    """lut[ids] * sqrt(model_dim), computed with Pallas TPU kernels."""
    B, S = ids.shape
    V, D = lut.shape
    scale = float(math.sqrt(D))
    n_tok = B * S

    # TODO(synk): nn.Embedding errors on out-of-range ids; we clamp instead so
    # a bad id can never drive an out-of-range DMA (documented deviation).
    flat_ids = jnp.clip(ids.reshape(-1).astype(jnp.int32), 0, V - 1)

    vmem_cap = _vmem_capacity_bytes()
    lut_bytes = lut.size * lut.dtype.itemsize
    # Keep the table resident when it fits comfortably in this generation's
    # VMEM (~45% of capacity: ~57 MiB on v5e/v6e, ~28 MiB on v7x).
    use_resident = (not force_hbm_gather) and lut_bytes <= int(0.45 * vmem_cap)

    if use_resident:
        out_flat = _embed_resident(flat_ids, lut, scale, block_tokens, vmem_cap)
    else:
        out_flat = _embed_hbm_gather(flat_ids, lut, scale, block_tokens, vmem_cap)

    return out_flat[:n_tok].reshape(B, S, D)


if __name__ == "__main__":
    # Small shapes consistent with the module's forward.
    vocab_size = 64
    model_dim = 128
    batch, seq = 2, 8

    key = jax.random.PRNGKey(0)
    k_lut, k_ids = jax.random.split(key)

    # nn.Embedding weight init ~ N(0, 1), deterministic here.
    lut = jax.random.normal(k_lut, (vocab_size, model_dim), dtype=jnp.float32)
    ids = jax.random.randint(k_ids, (batch, seq), 0, vocab_size, dtype=jnp.int32)

    ref = lut[ids] * math.sqrt(model_dim)

    # Main path: VMEM-resident LUT, exact copy-loop gather.
    out = jax.block_until_ready(embeddings_forward(ids, lut))
    assert out.shape == (batch, seq, model_dim)
    assert out.dtype == lut.dtype
    assert jnp.allclose(out, ref, atol=1e-6, rtol=1e-6), "resident path mismatch"

    # Large-vocab fallback path (forced so it is exercised and verified).
    out_fb = jax.block_until_ready(
        embeddings_forward(ids, lut, force_hbm_gather=True))
    assert jnp.allclose(out_fb, ref, atol=1e-6, rtol=1e-6), "hbm-gather path mismatch"

    print("KERNEL_OK")
</pallas_src>

<mosaic_0001>
module attributes {stable_mosaic.version = 11 : i64} {
  func.func @kernel(%arg0: i32, %arg1: memref<16xi32, #tpu.memory_space<smem>>, %arg2: memref<64x128xf32, #tpu.memory_space<vmem>>, %arg3: memref<16x128xf32, #tpu.memory_space<vmem>>) attributes {dimension_semantics = [#tpu.dimension_semantics<arbitrary>], iteration_bounds = array<i64: 1>, scalar_prefetch = 1 : i64, scratch_operands = 0 : i64, tpu.core_type = #tpu.core_type<tc>, window_params = [{pipeline_mode = #tpu.pipeline_mode<synchronous>, transform_indices = @transform_0, window_bounds = array<i64: 64, 128>}, {transform_indices = @transform_1, window_bounds = array<i64: 16, 128>}]} {
    %c16_i32 = arith.constant 16 : i32
    %0 = arith.muli %arg0, %c16_i32 : i32
    %c0_i32 = arith.constant 0 : i32
    %c16_i32_0 = arith.constant 16 : i32
    %1 = arith.addi %c0_i32, %c16_i32_0 : i32
    %c1_i32 = arith.constant 1 : i32
    scf.for %arg4 = %c0_i32 to %1 step %c1_i32  : i32 {
      %c1_i32_2 = arith.constant 1 : i32
      %2 = arith.muli %arg4, %c1_i32_2 : i32
      %c0_i32_3 = arith.constant 0 : i32
      %3 = arith.addi %c0_i32_3, %2 : i32
      %4 = arith.addi %0, %3 : i32
      %5 = arith.index_cast %4 : i32 to index
      %6 = memref.load %arg1[%5] : memref<16xi32, #tpu.memory_space<smem>>
      %7 = arith.index_cast %6 : i32 to index
      %c0 = arith.constant 0 : index
      %8 = vector.load %arg2[%7, %c0] : memref<64x128xf32, #tpu.memory_space<vmem>>, vector<1x128xf32>
      %cst = arith.constant 11.3137083 : f32
      %9 = vector.broadcast %cst : f32 to vector<1x128xf32>
      %10 = arith.mulf %8, %9 : vector<1x128xf32>
      %11 = arith.index_cast %3 : i32 to index
      %c0_4 = arith.constant 0 : index
      %12 = vector.load %arg3[%11, %c0_4] : memref<16x128xf32, #tpu.memory_space<vmem>>, vector<1x128xf32>
      tpu.vector_store %arg3[%11, %c0_4], %10 {strides = array<i32>} : memref<16x128xf32, #tpu.memory_space<vmem>>, vector<1x128xf32>,
    }
    %c16_i32_1 = arith.constant 16 : i32
    return
  }
  func.func @transform_0(%arg0: i32, %arg1: memref<16xi32, #tpu.memory_space<smem>>) -> (i32, i32) {
    %c0_i32 = arith.constant 0 : i32
    %c0_i32_0 = arith.constant 0 : i32
    %c0_i32_1 = arith.constant 0 : i32
    return %c0_i32, %c0_i32_0 : i32, i32
  }
  func.func @transform_1(%arg0: i32, %arg1: memref<16xi32, #tpu.memory_space<smem>>) -> (i32, i32) {
    %c0_i32 = arith.constant 0 : i32
    %c0_i32_0 = arith.constant 0 : i32
    return %arg0, %c0_i32 : i32, i32
  }
}

module attributes {stable_mosaic.version = 11 : i64} {
  func.func @kernel(%arg0: i32, %arg1: memref<16xi32, #tpu.memory_space<smem>>, %arg2: memref<64x128xf32, #tpu.memory_space<vmem>>, %arg3: memref<16x128xf32, #tpu.memory_space<vmem>>) attributes {dimension_semantics = [#tpu.dimension_semantics<arbitrary>], iteration_bounds = array<i64: 1>, scalar_prefetch = 1 : i64, scratch_operands = 0 : i64, tpu.core_type = #tpu.core_type<tc>, window_params = [{pipeline_mode = #tpu.pipeline_mode<synchronous>, transform_indices = @transform_0, window_bounds = array<i64: 64, 128>}, {transform_indices = @transform_1, window_bounds = array<i64: 16, 128>}]} {
    %c16_i32 = arith.constant 16 : i32
    %0 = arith.muli %arg0, %c16_i32 : i32
    %c0_i32 = arith.constant 0 : i32
    %c16_i32_0 = arith.constant 16 : i32
    %1 = arith.addi %c0_i32, %c16_i32_0 : i32
    %c1_i32 = arith.constant 1 : i32
    scf.for %arg4 = %c0_i32 to %1 step %c1_i32  : i32 {
      %c1_i32_2 = arith.constant 1 : i32
      %2 = arith.muli %arg4, %c1_i32_2 : i32
      %c0_i32_3 = arith.constant 0 : i32
      %3 = arith.addi %c0_i32_3, %2 : i32
      %4 = arith.addi %0, %3 : i32
      %5 = arith.index_cast %4 : i32 to index
      %6 = memref.load %arg1[%5] : memref<16xi32, #tpu.memory_space<smem>>
      %7 = arith.index_cast %6 : i32 to index
      %c0 = arith.constant 0 : index
      %8 = vector.load %arg2[%7, %c0] : memref<64x128xf32, #tpu.memory_space<vmem>>, vector<1x128xf32>
      %cst = arith.constant 11.3137083 : f32
      %9 = vector.broadcast %cst : f32 to vector<1x128xf32>
      %10 = arith.mulf %8, %9 : vector<1x128xf32>
      %11 = arith.index_cast %3 : i32 to index
      %c0_4 = arith.constant 0 : index
      %12 = vector.load %arg3[%11, %c0_4] : memref<16x128xf32, #tpu.memory_space<vmem>>, vector<1x128xf32>
      tpu.vector_store %arg3[%11, %c0_4], %10 {strides = array<i32>} : memref<16x128xf32, #tpu.memory_space<vmem>>, vector<1x128xf32>,
    }
    %c16_i32_1 = arith.constant 16 : i32
    return
  }
  func.func @transform_0(%arg0: i32, %arg1: memref<16xi32, #tpu.memory_space<smem>>) -> (i32, i32) {
    %c0_i32 = arith.constant 0 : i32
    %c0_i32_0 = arith.constant 0 : i32
    %c0_i32_1 = arith.constant 0 : i32
    return %c0_i32, %c0_i32_0 : i32, i32
  }
  func.func @transform_1(%arg0: i32, %arg1: memref<16xi32, #tpu.memory_space<smem>>) -> (i32, i32) {
    %c0_i32 = arith.constant 0 : i32
    %c0_i32_0 = arith.constant 0 : i32
    return %arg0, %c0_i32 : i32, i32
  }
}

</mosaic_0001>

<bundles_post_ra>
// kernel: tpu_custom_call.1
= control target key start
LH: loop header
LB: loop body
LE: loop exit
PB: predicated region body
PF: predicated region fallthrough
CT: control target
= control target key end

     0   :  { %s141_s9 = smov [#allocation3]   ;;  %s176_s0 = inlined_call_operand.hbm [shape: s32[16], index: 0, kind: input, shape index: {}]   ;;  %s177_s1 = inlined_call_operand.hbm [shape: f32[64,128], index: 1, kind: input, shape index: {}]   ;;  %s178_s2 = inlined_call_operand.hbm [shape: f32[16,128], index: 2, kind: output, shape index: {}]  }
   0x1   :  { %8 = dma.hbm_to_smem %s176_s0, 16, %s141_s9, [#allocation2] }
   0x2   :  { %131 = dma.done.wait [#allocation2], 16 }
   0x3   :  { %132 = vsyncadd [#allocation2], 4294967280 }
   0x4   :  { %10 = sfence }
   0x5   :  { %11 = vsyncpa [#allocation5], 0 }
   0x6   :  { %12 = vsyncpa [#allocation6], 0  ;;  %s142_s12 = smov [#allocation4]  }
   0x7   :  { %s18_s13 = sshll.u32 %s142_s12, 4  ;;  %s19_s13 = int_to_ptr.vmem [resolvable:$true] %s18_s13 }
   0x8   :  { %s95_s14 = scalar_lea.vmem %s19_s13, 1024  ;;  %p100_p1 = scmp.lt.s32.totalorder %s19_s13, %s19_s13 }
   0x9   :  { %p96_p0 = scmp.ne.s32.totalorder %s19_s13, %s95_s14  ;;  %p101_p2 = scmp.lt.s32.totalorder %s95_s14, %s95_s14 }
   0xb   :  { %p102_p3 = por %p101_p2, %p100_p1 }
   0xd   :  { %p103_p4 = pnand %p102_p3, %p96_p0 }
   0xf   :  { %106 = shalt.err (!%p103_p4)
}
  0x10   :  { %s143_s15 = smov 128   ;;  %s144_s16 = smov 8  }
  0x11   :  { %24 = dma.hbm_to_vmem [thread:$0]  %s177_s1, 1024, %s19_s13, [#allocation5], %s143_s15, %s143_s15, %s144_s16  }
  0x12   :  { %133 = dma.done.wait [#allocation5], 1024  }
  0x13   :  { %134 = vsyncadd [#allocation5], 4294966272  ;;  %s137_s18 = smov 0  }
  0x14 LB: > { %s36_s19 = sld [smem:[#allocation3 + %s139_s18]]  ;;  %s40_s21 = scalar_lea.vmem [#allocation7], %s139_s18  ;;  %s139_s18 = sphi %s137_s18, %s34_s18  }
  0x15   : > { %s34_s18 = sadd.s32 1, %s139_s18  }
  0x16   : > { %p31_p5 = scmp.ge.s32.totalorder %s34_s18, 16  }
  0x17   :  { %s145_s22 = smov (%p31_p5), [#allocation7]  }
  0x18   :  { %s47_s23 = sshll.u32 (%p31_p5), %s145_s22, 4  ;;  %s48_s23 = int_to_ptr.vmem [resolvable:$true] %s47_s23 }
  0x19   :  { %s107_s1 = scalar_lea.vmem (%p31_p5), %s48_s23, 256  ;;  %p112_p7 = scmp.lt.s32.totalorder (%p31_p5), %s48_s23, %s48_s23 }
  0x1a   : > { %s37_s20 = scalar_lea.vmem [#allocation4], %s36_s19  ;;  %33 = sbr.rel (!%p31_p5) target bundleno = 20 (0x14), region = 37 }
  0x1b   : > { %v38_v0 = vld [vmem:[%s37_s20] sm:$0x1]  ;;  %p108_p6 = scmp.ne.s32.totalorder (%p31_p5), %s48_s23, %s107_s1  ;;  %p113_p8 = scmp.lt.s32.totalorder (%p31_p5), %s107_s1, %s107_s1 }
  0x1c   : > { %v39_v1 = vmul.f32 11.313708, %v38_v0 }
  0x1d   :  { %p114_p9 = por (%p31_p5), %p113_p8, %p112_p7 }
  0x1e   : > { %41 = vst [vmem:[%s40_s21] sm:$0x1] %v39_v1 }
  0x1f   :  { %p115_p10 = pnand %p114_p9, %p108_p6 }
  0x21   :  { %118 = shalt.err (!%p115_p10)
}
  0x22   :  { %53 = dma.vmem_to_hbm [thread:$0]  %s48_s23, 256, %s178_s2, [#allocation6], %s143_s15, %s143_s15, %s144_s16  }
  0x23   :  { %135 = dma.done.wait [#allocation6], 256  }
  0x24   :  { %136 = vsyncadd [#allocation6], 4294967040 }
  0x25   :  { %57 = vsyncpa [#allocation5], 1 }
  0x26   :  { %58 = vsyncpa [#allocation6], 1 }

// kernel: tpu_custom_call.1
= control target key start
LH: loop header
LB: loop body
LE: loop exit
PB: predicated region body
PF: predicated region fallthrough
CT: control target
= control target key end

     0   :  { %s141_s9 = smov [#allocation3]   ;;  %s176_s0 = inlined_call_operand.hbm [shape: s32[16], index: 0, kind: input, shape index: {}]   ;;  %s177_s1 = inlined_call_operand.hbm [shape: f32[64,128], index: 1, kind: input, shape index: {}]   ;;  %s178_s2 = inlined_call_operand.hbm [shape: f32[16,128], index: 2, kind: output, shape index: {}]  }
   0x1   :  { %8 = dma.hbm_to_smem %s176_s0, 16, %s141_s9, [#allocation2] }
   0x2   :  { %131 = dma.done.wait [#allocation2], 16 }
   0x3   :  { %132 = vsyncadd [#allocation2], 4294967280 }
   0x4   :  { %10 = sfence }
   0x5   :  { %11 = vsyncpa [#allocation5], 0 }
   0x6   :  { %12 = vsyncpa [#allocation6], 0  ;;  %s142_s12 = smov [#allocation4]  }
   0x7   :  { %s18_s13 = sshll.u32 %s142_s12, 4  ;;  %s19_s13 = int_to_ptr.vmem [resolvable:$true] %s18_s13 }
   0x8   :  { %s95_s14 = scalar_lea.vmem %s19_s13, 1024  ;;  %p100_p1 = scmp.lt.s32.totalorder %s19_s13, %s19_s13 }
   0x9   :  { %p96_p0 = scmp.ne.s32.totalorder %s19_s13, %s95_s14  ;;  %p101_p2 = scmp.lt.s32.totalorder %s95_s14, %s95_s14 }
   0xb   :  { %p102_p3 = por %p101_p2, %p100_p1 }
   0xd   :  { %p103_p4 = pnand %p102_p3, %p96_p0 }
   0xf   :  { %106 = shalt.err (!%p103_p4)
}
  0x10   :  { %s143_s15 = smov 128   ;;  %s144_s16 = smov 8  }
  0x11   :  { %24 = dma.hbm_to_vmem [thread:$0]  %s177_s1, 1024, %s19_s13, [#allocation5], %s143_s15, %s143_s15, %s144_s16  }
  0x12   :  { %133 = dma.done.wait [#allocation5], 1024  }
  0x13   :  { %134 = vsyncadd [#allocation5], 4294966272  ;;  %s137_s18 = smov 0  }
  0x14 LB: > { %s36_s19 = sld [smem:[#allocation3 + %s139_s18]]  ;;  %s40_s21 = scalar_lea.vmem [#allocation7], %s139_s18  ;;  %s139_s18 = sphi %s137_s18, %s34_s18  }
  0x15   : > { %s34_s18 = sadd.s32 1, %s139_s18  }
  0x16   : > { %p31_p5 = scmp.ge.s32.totalorder %s34_s18, 16  }
  0x17   :  { %s145_s22 = smov (%p31_p5), [#allocation7]  }
  0x18   :  { %s47_s23 = sshll.u32 (%p31_p5), %s145_s22, 4  ;;  %s48_s23 = int_to_ptr.vmem [resolvable:$true] %s47_s23 }
  0x19   :  { %s107_s1 = scalar_lea.vmem (%p31_p5), %s48_s23, 256  ;;  %p112_p7 = scmp.lt.s32.totalorder (%p31_p5), %s48_s23, %s48_s23 }
  0x1a   : > { %s37_s20 = scalar_lea.vmem [#allocation4], %s36_s19  ;;  %33 = sbr.rel (!%p31_p5) target bundleno = 20 (0x14), region = 37 }
  0x1b   : > { %v38_v0 = vld [vmem:[%s37_s20] sm:$0x1]  ;;  %p108_p6 = scmp.ne.s32.totalorder (%p31_p5), %s48_s23, %s107_s1  ;;  %p113_p8 = scmp.lt.s32.totalorder (%p31_p5), %s107_s1, %s107_s1 }
  0x1c   : > { %v39_v1 = vmul.f32 11.313708, %v38_v0 }
  0x1d   :  { %p114_p9 = por (%p31_p5), %p113_p8, %p112_p7 }
  0x1e   : > { %41 = vst [vmem:[%s40_s21] sm:$0x1] %v39_v1 }
  0x1f   :  { %p115_p10 = pnand %p114_p9, %p108_p6 }
  0x21   :  { %118 = shalt.err (!%p115_p10)
}
  0x22   :  { %53 = dma.vmem_to_hbm [thread:$0]  %s48_s23, 256, %s178_s2, [#allocation6], %s143_s15, %s143_s15, %s144_s16  }
  0x23   :  { %135 = dma.done.wait [#allocation6], 256  }
  0x24   :  { %136 = vsyncadd [#allocation6], 4294967040 }
  0x25   :  { %57 = vsyncpa [#allocation5], 1 }
  0x26   :  { %58 = vsyncpa [#allocation6], 1 }

</bundles_post_ra>
